<compile_context>
chip_gen: v7x
topology: tpu7x:2x2x1
jax: 0.10.0
libtpu: 0.0.40
codegen_flags: <defaults>
</compile_context>

<pallas_src>
import jax
import jax.numpy as jnp
from jax.experimental import pallas as pl
from jax.experimental.pallas import tpu as pltpu


# Below this size the pallas_call is pure launch overhead for a metadata-only
# reshape; bypass it entirely.
_PALLAS_BYTES_THRESHOLD = 1 << 20   # 1 MiB
# Start splitting the copy into multiple in-flight DMAs above ~4 MiB.
_CHUNK_BYTES = 4 << 20
_MAX_DMA_CHUNKS = 4


def _make_hbm_copy_kernel(chunks):
    """Build an HBM->HBM DMA copy kernel.

    `chunks` is a static tuple of (start, size) slices along the leading axis.
    All DMAs are started before any wait so several copies stay in flight.
    """

    def kernel(x_hbm, o_hbm, sem):
        copies = []
        for idx, (start, size) in enumerate(chunks):
            cp = pltpu.make_async_copy(
                x_hbm.at[pl.ds(start, size)],
                o_hbm.at[pl.ds(start, size)],
                sem.at[idx],
            )
            cp.start()
            copies.append(cp)
        for cp in copies:
            cp.wait()

    return kernel


def _leading_chunks(dim, total_bytes):
    """Split the leading axis into a few roughly-equal static chunks."""
    if total_bytes < _CHUNK_BYTES or dim < 2:
        return ((0, dim),)
    n = min(_MAX_DMA_CHUNKS, dim)
    base, rem = divmod(dim, n)
    chunks, start = [], 0
    for i in range(n):
        size = base + (1 if i < rem else 0)
        chunks.append((start, size))
        start += size
    return tuple(chunks)


def flatten_consecutive(x, n, *, force_pallas=False):
    """Pallas equivalent of FlattenConsecutive(n).forward(x) for x of shape (B, T, C).

    (B, T, C) -> (B, T//n, C*n), squeezing the middle axis when it is 1.
    """
    B, T, C = x.shape
    assert T % n == 0, "T must be divisible by n"
    T_out = T // n

    # Metadata-only view change to the output logical shape (byte-identical).
    x_out_view = jnp.reshape(x, (B, T_out, C * n))

    itemsize = jnp.dtype(x.dtype).itemsize
    total_bytes = B * T * C * itemsize

    if force_pallas or total_bytes >= _PALLAS_BYTES_THRESHOLD:
        chunks = _leading_chunks(B, total_bytes)
        out = pl.pallas_call(
            _make_hbm_copy_kernel(chunks),
            out_shape=jax.ShapeDtypeStruct((B, T_out, C * n), x.dtype),
            in_specs=[pl.BlockSpec(memory_space=pl.ANY)],
            out_specs=pl.BlockSpec(memory_space=pl.ANY),
            scratch_shapes=[pltpu.SemaphoreType.DMA((len(chunks),))],
            cost_estimate=pl.CostEstimate(
                flops=0, transcendentals=0, bytes_accessed=2 * total_bytes),
        )(x_out_view)
    else:
        # Fast path: the op is free; no kernel, no copy.
        out = x_out_view

    if T_out == 1:
        out = jnp.reshape(out, (B, C * n))
    return out


if __name__ == "__main__":
    key = jax.random.PRNGKey(0)

    # Small makemore-style shapes: batch=2, context T=8, embedding C=4, n=2.
    B, T, C, n = 2, 8, 4, 2
    x = jax.random.normal(key, (B, T, C), dtype=jnp.float32)

    # Force the Pallas DMA-copy path so the kernel is exercised once.
    y = jax.block_until_ready(flatten_consecutive(x, n, force_pallas=True))
    y_ref = x.reshape(B, T // n, C * n)
    assert y.shape == y_ref.shape, (y.shape, y_ref.shape)
    assert jnp.allclose(y, y_ref), "mismatch vs reference reshape"

    # Squeeze path (T//n == 1), also through the kernel.
    x2 = jax.random.normal(jax.random.PRNGKey(1), (B, n, C), dtype=jnp.float32)
    y2 = jax.block_until_ready(flatten_consecutive(x2, n, force_pallas=True))
    y2_ref = x2.reshape(B, C * n)
    assert y2.shape == y2_ref.shape
    assert jnp.allclose(y2, y2_ref)

    # Fast-path (bypass) correctness on the small shape.
    y_fast = jax.block_until_ready(flatten_consecutive(x, n))
    assert y_fast.shape == y_ref.shape
    assert jnp.allclose(y_fast, y_ref)

    # Larger case: exceeds both the pallas threshold and the chunking
    # threshold, so it exercises the multi-DMA path of the kernel.
    B3, T3, C3, n3 = 512, 8, 256, 4   # 4 MiB f32
    x3 = jax.random.normal(jax.random.PRNGKey(2), (B3, T3, C3), dtype=jnp.float32)
    y3 = jax.block_until_ready(flatten_consecutive(x3, n3))
    y3_ref = x3.reshape(B3, T3 // n3, C3 * n3)
    assert y3.shape == y3_ref.shape
    assert jnp.allclose(y3, y3_ref)

    print("KERNEL_OK")
</pallas_src>

<mosaic_0001>
module attributes {stable_mosaic.version = 11 : i64} {
  func.func @kernel(%arg0: memref<2x4x8xf32, #tpu.memory_space<any>>, %arg1: memref<2x4x8xf32, #tpu.memory_space<any>>, %arg2: memref<1x!tpu.dma_semaphore, #tpu.memory_space<semaphore_mem>>) attributes {dimension_semantics = [], scalar_prefetch = 0 : i64, scratch_operands = 1 : i64, tpu.core_type = #tpu.core_type<tc>} {
    %c0_i32 = arith.constant 0 : i32
    %c0_i32_0 = arith.constant 0 : i32
    %c0_i32_1 = arith.constant 0 : i32
    %c0_i32_2 = arith.constant 0 : i32
    %0 = tpu.memref_slice %arg0[%c0_i32_0, %c0_i32_1, %c0_i32_2] : memref<2x4x8xf32, #tpu.memory_space<any>> -> memref<2x4x8xf32, #tpu.memory_space<any>>
    %c0_i32_3 = arith.constant 0 : i32
    %c0_i32_4 = arith.constant 0 : i32
    %c0_i32_5 = arith.constant 0 : i32
    %1 = tpu.memref_slice %arg1[%c0_i32_3, %c0_i32_4, %c0_i32_5] : memref<2x4x8xf32, #tpu.memory_space<any>> -> memref<2x4x8xf32, #tpu.memory_space<any>>
    %2 = tpu.memref_slice %arg2[%c0_i32] : memref<1x!tpu.dma_semaphore, #tpu.memory_space<semaphore_mem>> -> memref<1x!tpu.dma_semaphore, #tpu.memory_space<semaphore_mem>>
    %3 = tpu.memref_squeeze %2 : memref<1x!tpu.dma_semaphore, #tpu.memory_space<semaphore_mem>> -> memref<!tpu.dma_semaphore, #tpu.memory_space<semaphore_mem>>
    tpu.enqueue_dma source(%0 : memref<2x4x8xf32, #tpu.memory_space<any>>) target(%1 : memref<2x4x8xf32, #tpu.memory_space<any>>) target_semaphore(%3 : memref<!tpu.dma_semaphore, #tpu.memory_space<semaphore_mem>>)
    %c0_i32_6 = arith.constant 0 : i32
    %c0_i32_7 = arith.constant 0 : i32
    %c0_i32_8 = arith.constant 0 : i32
    %c0_i32_9 = arith.constant 0 : i32
    %4 = tpu.memref_slice %arg0[%c0_i32_7, %c0_i32_8, %c0_i32_9] : memref<2x4x8xf32, #tpu.memory_space<any>> -> memref<2x4x8xf32, #tpu.memory_space<any>>
    %c0_i32_10 = arith.constant 0 : i32
    %c0_i32_11 = arith.constant 0 : i32
    %c0_i32_12 = arith.constant 0 : i32
    %5 = tpu.memref_slice %arg1[%c0_i32_10, %c0_i32_11, %c0_i32_12] : memref<2x4x8xf32, #tpu.memory_space<any>> -> memref<2x4x8xf32, #tpu.memory_space<any>>
    %6 = tpu.memref_slice %arg2[%c0_i32_6] : memref<1x!tpu.dma_semaphore, #tpu.memory_space<semaphore_mem>> -> memref<1x!tpu.dma_semaphore, #tpu.memory_space<semaphore_mem>>
    %7 = tpu.memref_squeeze %6 : memref<1x!tpu.dma_semaphore, #tpu.memory_space<semaphore_mem>> -> memref<!tpu.dma_semaphore, #tpu.memory_space<semaphore_mem>>
    tpu.wait_dma2 semaphore(%7 : memref<!tpu.dma_semaphore, #tpu.memory_space<semaphore_mem>>) src(%4 : memref<2x4x8xf32, #tpu.memory_space<any>>) dst(%5 : memref<2x4x8xf32, #tpu.memory_space<any>>)
    return
  }
}

</mosaic_0001>

<bundles_post_ra>
// kernel: tpu_custom_call.1
= control target key start
LH: loop header
LB: loop body
LE: loop exit
PB: predicated region body
PF: predicated region fallthrough
CT: control target
= control target key end

     0   :  { %s35_s6 = smov [#allocation2]   ;;  %s36_s7 = smov [#allocation3]   ;;  %s54_s0 = inlined_call_operand.hbm [shape: f32[2,4,8], index: 0, kind: input, shape index: {}]   ;;  %s55_s1 = inlined_call_operand.hbm [shape: f32[2,4,8], index: 1, kind: output, shape index: {}]  }
   0x1   :  { %s37_s8 = smov 0  }
   0x2   :  { %18 = dma.general %s54_s0, 128, %s55_s1, %s35_s6, %s36_s7, [#allocation4], %s37_s8, 0  }
   0x3   :  { %33 = dma.done.wait [#allocation2], 128 }
   0x4   :  { %34 = vsyncadd [#allocation2], 4294967168 }
   0x5   :  { %23 = vsyncmov [#allocation2] }
   0x8   :  { %s24_s13 = vpop.sfrf %23 }
   0x9   :  { %p29_p0 = scmp.ne.s32.totalorder %s24_s13, 0 }
   0xb   :  { %28 = shalt.err (%p29_p0)  }

</bundles_post_ra>
